<compile_context>
chip_gen: v7x
topology: tpu7x:2x2x1
jax: 0.10.0
libtpu: 0.0.40
codegen_flags: <defaults>
</compile_context>

<pallas_src>
import functools

import jax
import jax.numpy as jnp
from jax.experimental import pallas as pl
from jax.experimental.pallas import tpu as pltpu


def _spec(shape, index_map, buffer_count=None):
    """BlockSpec helper; buffer_count=1 single-buffers grid-constant blocks."""
    if buffer_count is not None:
        try:
            return pl.BlockSpec(shape, index_map, pipeline_mode=pl.Buffered(buffer_count))
        except Exception:  # pipeline_mode / Buffered unavailable -> default pipelining
            pass
    return pl.BlockSpec(shape, index_map)


def _pick_tile(S, target):
    """Largest 128-multiple divisor of S that is <= target (or S itself if S is small)."""
    if S <= target:
        return S
    t = (target // 128) * 128
    while t >= 128:
        if S % t == 0:
            return t
        t -= 128
    return S


# --------------------------------------------------------------------------- kernel 1
def qkv_proj_kernel(x_ref, wqkv_ref, bqkv_ref, kv_ref, qh_ref, kt_ref, v_ref):
    """Fused QKV projection for one (batch, seq-tile) block."""
    E = x_ref.shape[2]
    H = qh_ref.shape[1]
    Dh = qh_ref.shape[3]

    x = x_ref[0]                                                     # (ts, E) bf16
    qkv = jnp.dot(x, wqkv_ref[...], preferred_element_type=jnp.float32)
    qkv = qkv + bqkv_ref[...]                                        # (ts, E + 2*Dh) f32

    kv = qkv[:, E:]                                                  # (ts, 2*Dh) lane-dense slab
    kv_ref[0] = kv                                                   # returned K|V cache (f32)
    k = kv[:, :Dh]
    v = kv[:, Dh:]
    kt_ref[0] = jnp.transpose(k).astype(jnp.bfloat16)                # K^T, transposed ONCE here
    v_ref[0] = v.astype(jnp.bfloat16)

    q = qkv[:, :E]                                                   # already scaled by 1/sqrt(Dh)
    for h in range(H):                                               # head split hoisted here
        qh_ref[0, h] = q[:, h * Dh:(h + 1) * Dh].astype(jnp.bfloat16)


# --------------------------------------------------------------------------- kernel 2
def flash_mqa_kernel(qh_ref, kt_ref, v_ref, wo_ref, bo_ref, out_ref,
                     m_sc, l_sc, acc_sc, oacc_sc, *, approx_recip=True):
    h = pl.program_id(2)
    ki = pl.program_id(3)
    nh = pl.num_programs(2)
    nk = pl.num_programs(3)

    @pl.when(jnp.logical_and(h == 0, ki == 0))
    def _():
        oacc_sc[...] = jnp.zeros(oacc_sc.shape, oacc_sc.dtype)

    @pl.when(ki == 0)
    def _():
        m_sc[...] = jnp.full(m_sc.shape, -jnp.inf, m_sc.dtype)
        l_sc[...] = jnp.zeros(l_sc.shape, l_sc.dtype)
        acc_sc[...] = jnp.zeros(acc_sc.shape, acc_sc.dtype)

    q = qh_ref[0, 0]                                                 # (tq, Dh) bf16
    kt = kt_ref[0]                                                   # (Dh, tk) bf16, pre-transposed
    s = jnp.dot(q, kt, preferred_element_type=jnp.float32)           # (tq, tk) f32

    m_new = jnp.maximum(m_sc[...], jnp.max(s, axis=-1, keepdims=True))
    alpha = jnp.exp(m_sc[...] - m_new)
    p = jnp.exp(s - m_new)
    l_sc[...] = alpha * l_sc[...] + jnp.sum(p, axis=-1, keepdims=True)
    acc_sc[...] = alpha * acc_sc[...] + jnp.dot(
        p.astype(jnp.bfloat16), v_ref[0], preferred_element_type=jnp.float32)
    m_sc[...] = m_new

    @pl.when(ki == nk - 1)
    def _():
        if approx_recip:
            z = acc_sc[...] * pl.reciprocal(l_sc[...], approx=True)  # EUP slot
        else:
            z = acc_sc[...] / l_sc[...]
        oacc_sc[...] += jnp.dot(z.astype(jnp.bfloat16), wo_ref[...],
                                preferred_element_type=jnp.float32)

    @pl.when(jnp.logical_and(ki == nk - 1, h == nh - 1))
    def _():
        out_ref[0] = (oacc_sc[...] + bo_ref[...]).astype(out_ref.dtype)


# --------------------------------------------------------------------------- wrapper
def multi_query_attention(x, params, *, num_heads, q_tile=256, kv_tile=512,
                          proj_tile=512, approx_recip=True):
    """x: (B, S, E) float32. Returns (output (B,S,O), K (B,1,S,Dh), V (B,1,S,Dh))."""
    B, S, E = x.shape
    Dh = E // num_heads
    O = params["wo"].shape[1]
    F = E + 2 * Dh
    inv_scale = 1.0 / (float(Dh) ** 0.5)

    # Fold the attention scale into the query projection, fuse Q/K/V weights and biases.
    wqkv = jnp.concatenate([params["wq"] * inv_scale, params["wk"], params["wv"]], axis=1)
    bqkv = jnp.concatenate([params["bq"] * inv_scale, params["bk"], params["bv"]], axis=1)
    x_bf = x.astype(jnp.bfloat16)
    wqkv_bf = wqkv.astype(jnp.bfloat16)
    wo_bf = params["wo"].astype(jnp.bfloat16)
    bo = params["bo"]

    ts = _pick_tile(S, proj_tile)
    tq = _pick_tile(S, q_tile)
    tk = _pick_tile(S, kv_tile)

    mib = 1 << 20
    proj_vmem = (2 * (ts * E * 2 + ts * 2 * Dh * 4 + num_heads * ts * Dh * 2
                      + Dh * ts * 2 + ts * Dh * 2)
                 + E * F * 2 + F * 4)                                  # single-buffered weights
    attn_vmem = (2 * (tq * Dh * 2 + Dh * tk * 2 + tk * Dh * 2 + Dh * O * 2 + tq * O * 4)
                 + O * 4 + tq * (2 + Dh + O) * 4)                      # + scratch
    proj_limit = int(min(48 * mib, max(32 * mib, 2 * proj_vmem)))
    attn_limit = int(min(48 * mib, max(32 * mib, 2 * attn_vmem)))

    # ---- kernel 1: fused QKV projection --------------------------------------------
    kv, qh, kt, v_bf = pl.pallas_call(
        qkv_proj_kernel,
        out_shape=(
            jax.ShapeDtypeStruct((B, S, 2 * Dh), jnp.float32),         # K|V slab (returned cache)
            jax.ShapeDtypeStruct((B, num_heads, S, Dh), jnp.bfloat16), # Q, head-major
            jax.ShapeDtypeStruct((B, Dh, S), jnp.bfloat16),            # K^T
            jax.ShapeDtypeStruct((B, S, Dh), jnp.bfloat16),            # V
        ),
        grid_spec=pltpu.PrefetchScalarGridSpec(
            num_scalar_prefetch=0,
            grid=(B, S // ts),
            in_specs=[
                pl.BlockSpec((1, ts, E), lambda b, si: (b, si, 0)),
                _spec((E, F), lambda b, si: (0, 0), buffer_count=1),   # grid-constant weights
                _spec((1, F), lambda b, si: (0, 0), buffer_count=1),
            ],
            out_specs=[
                pl.BlockSpec((1, ts, 2 * Dh), lambda b, si: (b, si, 0)),
                pl.BlockSpec((1, num_heads, ts, Dh), lambda b, si: (b, 0, si, 0)),
                pl.BlockSpec((1, Dh, ts), lambda b, si: (b, 0, si)),
                pl.BlockSpec((1, ts, Dh), lambda b, si: (b, si, 0)),
            ],
        ),
        compiler_params=pltpu.CompilerParams(
            dimension_semantics=("parallel", "parallel"),
            vmem_limit_bytes=proj_limit,
        ),
    )(x_bf, wqkv_bf, bqkv)

    # ---- kernel 2: flash MQA + fused output projection ------------------------------
    kernel2 = functools.partial(flash_mqa_kernel, approx_recip=approx_recip)
    out = pl.pallas_call(
        kernel2,
        out_shape=jax.ShapeDtypeStruct((B, S, O), jnp.float32),
        grid_spec=pltpu.PrefetchScalarGridSpec(
            num_scalar_prefetch=0,
            grid=(B, S // tq, num_heads, S // tk),
            in_specs=[
                pl.BlockSpec((1, 1, tq, Dh), lambda b, qi, h, ki: (b, h, qi, 0)),
                pl.BlockSpec((1, Dh, tk), lambda b, qi, h, ki: (b, 0, ki)),
                pl.BlockSpec((1, tk, Dh), lambda b, qi, h, ki: (b, ki, 0)),
                pl.BlockSpec((Dh, O), lambda b, qi, h, ki: (h, 0)),    # Wo rows for head h
                _spec((1, O), lambda b, qi, h, ki: (0, 0), buffer_count=1),
            ],
            out_specs=pl.BlockSpec((1, tq, O), lambda b, qi, h, ki: (b, qi, 0)),
            scratch_shapes=[
                pltpu.VMEM((tq, 1), jnp.float32),    # running max
                pltpu.VMEM((tq, 1), jnp.float32),    # running sum
                pltpu.VMEM((tq, Dh), jnp.float32),   # per-head flash accumulator
                pltpu.VMEM((tq, O), jnp.float32),    # output-projection accumulator
            ],
        ),
        compiler_params=pltpu.CompilerParams(
            dimension_semantics=("parallel", "parallel", "arbitrary", "arbitrary"),
            vmem_limit_bytes=attn_limit,
        ),
    )(qh, kt, v_bf, wo_bf, bo)

    # Match PyTorch return shapes: K, V are (B, 1, S, head_dim).
    K = kv[:, None, :, :Dh]
    V = kv[:, None, :, Dh:]
    return out, K, V


# --------------------------------------------------------------------------- reference
def reference(x, params, *, num_heads):
    """Pure-JAX f32 reference mirroring the PyTorch forward."""
    B, S, E = x.shape
    Dh = E // num_heads
    scale = float(Dh) ** 0.5
    Q = x @ params["wq"] + params["bq"][0]
    K = x @ params["wk"] + params["bk"][0]
    V = x @ params["wv"] + params["bv"][0]
    Qh = Q.reshape(B, S, num_heads, Dh).transpose(0, 2, 1, 3)          # (B,H,S,Dh)
    Kh = K.reshape(B, S, 1, Dh).transpose(0, 2, 1, 3)                  # (B,1,S,Dh)
    Vh = V.reshape(B, S, 1, Dh).transpose(0, 2, 1, 3)                  # (B,1,S,Dh)
    scores = jnp.einsum("bhqd,bokd->bhqk", Qh, Kh) / scale
    w = jax.nn.softmax(scores, axis=-1)
    z = jnp.einsum("bhqk,bokd->bhqd", w, Vh)
    z = z.transpose(0, 2, 1, 3).reshape(B, S, E)
    out = z @ params["wo"] + params["bo"][0]
    return out, Kh, Vh


def init_params(key, emb_dim, num_heads, output_dim):
    head_dim = emb_dim // num_heads
    ks = jax.random.split(key, 8)

    def lin(kw, kb, fan_in, fan_out):
        w = jax.random.normal(kw, (fan_in, fan_out), jnp.float32) * 0.05
        b = jax.random.normal(kb, (1, fan_out), jnp.float32) * 0.05
        return w, b

    wq, bq = lin(ks[0], ks[1], emb_dim, emb_dim)
    wk, bk = lin(ks[2], ks[3], emb_dim, head_dim)
    wv, bv = lin(ks[4], ks[5], emb_dim, head_dim)
    wo, bo = lin(ks[6], ks[7], emb_dim, output_dim)
    return dict(wq=wq, bq=bq, wk=wk, bk=bk, wv=wv, bv=bv, wo=wo, bo=bo)


if __name__ == "__main__":
    B, S, E, H, O = 2, 8, 32, 4, 16
    key = jax.random.PRNGKey(0)
    kx, kp = jax.random.split(key)
    x = jax.random.normal(kx, (B, S, E), jnp.float32)
    params = init_params(kp, E, H, O)

    out, K, V = multi_query_attention(x, params, num_heads=H)
    jax.block_until_ready((out, K, V))

    ro, rk, rv = reference(x, params, num_heads=H)
    assert out.shape == (B, S, O) and K.shape == (B, 1, S, E // H) and V.shape == (B, 1, S, E // H)
    # bf16 matmul operands + approx reciprocal -> loosened tolerance vs. the f32 reference.
    assert jnp.allclose(out, ro, atol=2e-2, rtol=2e-2)
    assert jnp.allclose(K, rk, atol=2e-2, rtol=2e-2)
    assert jnp.allclose(V, rv, atol=2e-2, rtol=2e-2)
    print("KERNEL_OK")
</pallas_src>

<mosaic_0001>
module attributes {stable_mosaic.version = 11 : i64} {
  func.func @qkv_proj_kernel(%arg0: i32, %arg1: i32, %arg2: memref<1x8x32xbf16, #tpu.memory_space<vmem>>, %arg3: memref<32x48xbf16, #tpu.memory_space<vmem>>, %arg4: memref<1x48xf32, #tpu.memory_space<vmem>>, %arg5: memref<1x8x16xf32, #tpu.memory_space<vmem>>, %arg6: memref<1x4x8x8xbf16, #tpu.memory_space<vmem>>, %arg7: memref<1x8x8xbf16, #tpu.memory_space<vmem>>, %arg8: memref<1x8x8xbf16, #tpu.memory_space<vmem>>) attributes {dimension_semantics = [#tpu.dimension_semantics<parallel>, #tpu.dimension_semantics<parallel>], iteration_bounds = array<i64: 2, 1>, scalar_prefetch = 0 : i64, scratch_operands = 0 : i64, tpu.core_type = #tpu.core_type<tc>, window_params = [{transform_indices = @transform_0, window_bounds = array<i64: 1, 8, 32>}, {pipeline_mode = #tpu.pipeline_mode<synchronous>, transform_indices = @transform_1, window_bounds = array<i64: 32, 48>}, {pipeline_mode = #tpu.pipeline_mode<synchronous>, transform_indices = @transform_2, window_bounds = array<i64: 1, 48>}, {transform_indices = @transform_3, window_bounds = array<i64: 1, 8, 16>}, {transform_indices = @transform_4, window_bounds = array<i64: 1, 4, 8, 8>}, {transform_indices = @transform_5, window_bounds = array<i64: 1, 8, 8>}, {transform_indices = @transform_6, window_bounds = array<i64: 1, 8, 8>}]} {
    %c0 = arith.constant 0 : index
    %c0_0 = arith.constant 0 : index
    %c0_1 = arith.constant 0 : index
    %0 = vector.load %arg2[%c0, %c0_0, %c0_1] : memref<1x8x32xbf16, #tpu.memory_space<vmem>>, vector<1x8x32xbf16>
    %1 = vector.shape_cast %0 : vector<1x8x32xbf16> to vector<8x32xbf16>
    %c0_2 = arith.constant 0 : index
    %c0_3 = arith.constant 0 : index
    %2 = vector.load %arg3[%c0_2, %c0_3] : memref<32x48xbf16, #tpu.memory_space<vmem>>, vector<32x48xbf16>
    %cst = arith.constant dense<0.000000e+00> : vector<8x48xf32>
    %3 = tpu.matmul %1, %2, %cst {dimension_numbers = #tpu.dot_dimension_numbers<[1], [0], [0], [1], [0, 0, 1, 1], [], []>} : vector<8x32xbf16>, vector<32x48xbf16>, vector<8x48xf32> -> vector<8x48xf32>
    %c0_4 = arith.constant 0 : index
    %c0_5 = arith.constant 0 : index
    %4 = vector.load %arg4[%c0_4, %c0_5] : memref<1x48xf32, #tpu.memory_space<vmem>>, vector<1x48xf32>
    %5 = vector.broadcast %4 : vector<1x48xf32> to vector<8x48xf32>
    %6 = arith.addf %3, %5 : vector<8x48xf32>
    %7 = vector.extract_strided_slice %6 {offsets = [0, 32], sizes = [8, 16], strides = [1, 1]} : vector<8x48xf32> to vector<8x16xf32>
    %c0_6 = arith.constant 0 : index
    %c0_7 = arith.constant 0 : index
    %c0_8 = arith.constant 0 : index
    %8 = vector.load %arg5[%c0_6, %c0_7, %c0_8] : memref<1x8x16xf32, #tpu.memory_space<vmem>>, vector<1x8x16xf32>
    %9 = vector.shape_cast %8 : vector<1x8x16xf32> to vector<8x16xf32>
    %10 = vector.shape_cast %7 : vector<8x16xf32> to vector<1x8x16xf32>
    tpu.vector_store %arg5[%c0_6, %c0_7, %c0_8], %10 {strides = array<i32>} : memref<1x8x16xf32, #tpu.memory_space<vmem>>, vector<1x8x16xf32>,
    %11 = vector.extract_strided_slice %7 {offsets = [0, 0], sizes = [8, 8], strides = [1, 1]} : vector<8x16xf32> to vector<8x8xf32>
    %12 = vector.extract_strided_slice %7 {offsets = [0, 8], sizes = [8, 8], strides = [1, 1]} : vector<8x16xf32> to vector<8x8xf32>
    %13 = tpu.transpose %11, [1, 0] : vector<8x8xf32> -> vector<8x8xf32>
    %14 = arith.truncf %13 : vector<8x8xf32> to vector<8x8xbf16>
    %c0_9 = arith.constant 0 : index
    %c0_10 = arith.constant 0 : index
    %c0_11 = arith.constant 0 : index
    %15 = vector.load %arg7[%c0_9, %c0_10, %c0_11] : memref<1x8x8xbf16, #tpu.memory_space<vmem>>, vector<1x8x8xbf16>
    %16 = vector.shape_cast %15 : vector<1x8x8xbf16> to vector<8x8xbf16>
    %17 = vector.shape_cast %14 : vector<8x8xbf16> to vector<1x8x8xbf16>
    tpu.vector_store %arg7[%c0_9, %c0_10, %c0_11], %17 {strides = array<i32>} : memref<1x8x8xbf16, #tpu.memory_space<vmem>>, vector<1x8x8xbf16>,
    %18 = arith.truncf %12 : vector<8x8xf32> to vector<8x8xbf16>
    %c0_12 = arith.constant 0 : index
    %c0_13 = arith.constant 0 : index
    %c0_14 = arith.constant 0 : index
    %19 = vector.load %arg8[%c0_12, %c0_13, %c0_14] : memref<1x8x8xbf16, #tpu.memory_space<vmem>>, vector<1x8x8xbf16>
    %20 = vector.shape_cast %19 : vector<1x8x8xbf16> to vector<8x8xbf16>
    %21 = vector.shape_cast %18 : vector<8x8xbf16> to vector<1x8x8xbf16>
    tpu.vector_store %arg8[%c0_12, %c0_13, %c0_14], %21 {strides = array<i32>} : memref<1x8x8xbf16, #tpu.memory_space<vmem>>, vector<1x8x8xbf16>,
    %22 = vector.extract_strided_slice %6 {offsets = [0, 0], sizes = [8, 32], strides = [1, 1]} : vector<8x48xf32> to vector<8x32xf32>
    %23 = vector.extract_strided_slice %22 {offsets = [0, 0], sizes = [8, 8], strides = [1, 1]} : vector<8x32xf32> to vector<8x8xf32>
    %24 = arith.truncf %23 : vector<8x8xf32> to vector<8x8xbf16>
    %c0_15 = arith.constant 0 : index
    %c0_16 = arith.constant 0 : index
    %c0_17 = arith.constant 0 : index
    %c0_18 = arith.constant 0 : index
    %25 = vector.load %arg6[%c0_15, %c0_16, %c0_17, %c0_18] : memref<1x4x8x8xbf16, #tpu.memory_space<vmem>>, vector<1x1x8x8xbf16>
    %26 = vector.shape_cast %25 : vector<1x1x8x8xbf16> to vector<8x8xbf16>
    %27 = vector.shape_cast %24 : vector<8x8xbf16> to vector<1x1x8x8xbf16>
    tpu.vector_store %arg6[%c0_15, %c0_16, %c0_17, %c0_18], %27 {strides = array<i32>} : memref<1x4x8x8xbf16, #tpu.memory_space<vmem>>, vector<1x1x8x8xbf16>,
    %28 = vector.extract_strided_slice %22 {offsets = [0, 8], sizes = [8, 8], strides = [1, 1]} : vector<8x32xf32> to vector<8x8xf32>
    %29 = arith.truncf %28 : vector<8x8xf32> to vector<8x8xbf16>
    %c0_19 = arith.constant 0 : index
    %c1 = arith.constant 1 : index
    %c0_20 = arith.constant 0 : index
    %c0_21 = arith.constant 0 : index
    %30 = vector.load %arg6[%c0_19, %c1, %c0_20, %c0_21] : memref<1x4x8x8xbf16, #tpu.memory_space<vmem>>, vector<1x1x8x8xbf16>
    %31 = vector.shape_cast %30 : vector<1x1x8x8xbf16> to vector<8x8xbf16>
    %32 = vector.shape_cast %29 : vector<8x8xbf16> to vector<1x1x8x8xbf16>
    tpu.vector_store %arg6[%c0_19, %c1, %c0_20, %c0_21], %32 {strides = array<i32>} : memref<1x4x8x8xbf16, #tpu.memory_space<vmem>>, vector<1x1x8x8xbf16>,
    %33 = vector.extract_strided_slice %22 {offsets = [0, 16], sizes = [8, 8], strides = [1, 1]} : vector<8x32xf32> to vector<8x8xf32>
    %34 = arith.truncf %33 : vector<8x8xf32> to vector<8x8xbf16>
    %c0_22 = arith.constant 0 : index
    %c2 = arith.constant 2 : index
    %c0_23 = arith.constant 0 : index
    %c0_24 = arith.constant 0 : index
    %35 = vector.load %arg6[%c0_22, %c2, %c0_23, %c0_24] : memref<1x4x8x8xbf16, #tpu.memory_space<vmem>>, vector<1x1x8x8xbf16>
    %36 = vector.shape_cast %35 : vector<1x1x8x8xbf16> to vector<8x8xbf16>
    %37 = vector.shape_cast %34 : vector<8x8xbf16> to vector<1x1x8x8xbf16>
    tpu.vector_store %arg6[%c0_22, %c2, %c0_23, %c0_24], %37 {strides = array<i32>} : memref<1x4x8x8xbf16, #tpu.memory_space<vmem>>, vector<1x1x8x8xbf16>,
    %38 = vector.extract_strided_slice %22 {offsets = [0, 24], sizes = [8, 8], strides = [1, 1]} : vector<8x32xf32> to vector<8x8xf32>
    %39 = arith.truncf %38 : vector<8x8xf32> to vector<8x8xbf16>
    %c0_25 = arith.constant 0 : index
    %c3 = arith.constant 3 : index
    %c0_26 = arith.constant 0 : index
    %c0_27 = arith.constant 0 : index
    %40 = vector.load %arg6[%c0_25, %c3, %c0_26, %c0_27] : memref<1x4x8x8xbf16, #tpu.memory_space<vmem>>, vector<1x1x8x8xbf16>
    %41 = vector.shape_cast %40 : vector<1x1x8x8xbf16> to vector<8x8xbf16>
    %42 = vector.shape_cast %39 : vector<8x8xbf16> to vector<1x1x8x8xbf16>
    tpu.vector_store %arg6[%c0_25, %c3, %c0_26, %c0_27], %42 {strides = array<i32>} : memref<1x4x8x8xbf16, #tpu.memory_space<vmem>>, vector<1x1x8x8xbf16>,
    return
  }
  func.func @transform_0(%arg0: i32, %arg1: i32) -> (i32, i32, i32) {
    %c0_i32 = arith.constant 0 : i32
    %c0_i32_0 = arith.constant 0 : i32
    return %arg0, %arg1, %c0_i32 : i32, i32, i32
  }
  func.func @transform_1(%arg0: i32, %arg1: i32) -> (i32, i32) {
    %c0_i32 = arith.constant 0 : i32
    %c0_i32_0 = arith.constant 0 : i32
    %c0_i32_1 = arith.constant 0 : i32
    return %c0_i32, %c0_i32_0 : i32, i32
  }
  func.func @transform_2(%arg0: i32, %arg1: i32) -> (i32, i32) {
    %c0_i32 = arith.constant 0 : i32
    %c0_i32_0 = arith.constant 0 : i32
    %c0_i32_1 = arith.constant 0 : i32
    return %c0_i32, %c0_i32_0 : i32, i32
  }
  func.func @transform_3(%arg0: i32, %arg1: i32) -> (i32, i32, i32) {
    %c0_i32 = arith.constant 0 : i32
    %c0_i32_0 = arith.constant 0 : i32
    return %arg0, %arg1, %c0_i32 : i32, i32, i32
  }
  func.func @transform_4(%arg0: i32, %arg1: i32) -> (i32, i32, i32, i32) {
    %c0_i32 = arith.constant 0 : i32
    %c0_i32_0 = arith.constant 0 : i32
    %c0_i32_1 = arith.constant 0 : i32
    return %arg0, %c0_i32, %arg1, %c0_i32_0 : i32, i32, i32, i32
  }
  func.func @transform_5(%arg0: i32, %arg1: i32) -> (i32, i32, i32) {
    %c0_i32 = arith.constant 0 : i32
    %c0_i32_0 = arith.constant 0 : i32
    return %arg0, %c0_i32, %arg1 : i32, i32, i32
  }
  func.func @transform_6(%arg0: i32, %arg1: i32) -> (i32, i32, i32) {
    %c0_i32 = arith.constant 0 : i32
    %c0_i32_0 = arith.constant 0 : i32
    return %arg0, %arg1, %c0_i32 : i32, i32, i32
  }
}

</mosaic_0001>

<bundles_post_ra>
// kernel: tpu_custom_call.1
= control target key start
LH: loop header
LB: loop body
LE: loop exit
PB: predicated region body
PF: predicated region fallthrough
CT: control target
= control target key end

     0   :  { %s1484_s0 = inlined_call_operand.hbm [shape: bf16[2,8,32], index: 0, kind: input, shape index: {}]   ;;  %s1485_s1 = inlined_call_operand.hbm [shape: bf16[32,48], index: 1, kind: input, shape index: {}]   ;;  %s1486_s2 = inlined_call_operand.vmem [shape: f32[1,48], index: 2, kind: input, shape index: {}]   ;;  %s1487_s3 = inlined_call_operand.hbm [shape: f32[2,8,16], index: 3, kind: output, shape index: {0}]   ;;  %s1488_s4 = inlined_call_operand.hbm [shape: bf16[2,4,8,8], index: 4, kind: output, shape index: {1}]   ;;  %s1489_s5 = inlined_call_operand.hbm [shape: bf16[2,8,8], index: 5, kind: output, shape index: {2}]   ;;  %s1490_s6 = inlined_call_operand.hbm [shape: bf16[2,8,8], index: 6, kind: output, shape index: {3}]  }
   0x1   :  { %1495 = sst [smem:[#allocation18_spill]] %s1484_s0 }
   0x2   :  { %1496 = sst [smem:[#allocation19_spill]] %s1485_s1 }
   0x3   :  { %1497 = sst [smem:[#allocation20_spill]] %s1486_s2 }
   0x4   :  { %12 = vsyncpa [#allocation3], 0 }
   0x5   :  { %14 = vsyncpa [#allocation3 + $0x1], 0 }
   0x6   :  { %15 = vsyncpa [#allocation6], 0 }
   0x7   :  { %16 = vsyncpa [#allocation4], 0 }
   0x8   :  { %18 = vsyncpa [#allocation4 + $0x1], 0 }
   0x9   :  { %19 = vsyncpa [#allocation9], 0 }
   0xa   :  { %21 = vsyncpa [#allocation9 + $0x1], 0 }
   0xb   :  { %22 = vsyncpa [#allocation12], 0 }
   0xc   :  { %24 = vsyncpa [#allocation12 + $0x1], 0  ;;  %s1166_s21 = smov 0   ;;  %s1168_s22 = smov 0  }
   0xd   :  { %s1170_s23 = smov 0   ;;  %s1172_s24 = smov 0  }
   0xe   :  { %s1174_s25 = smov 0   ;;  %s1176_s26 = smov 0  }
   0xf LB: > { %s1197_s27 = sadd.s32 4294967295, %s1112_s26   ;;  %s1494_s28 = sadd.s32 4294967294, %s1112_s26   ;;  %s1112_s26 = sphi %s1176_s26, %s30_s26   ;;  %s1108_s25 = sphi %s1174_s25, %s1520_s25   ;;  %s1104_s24 = sphi %s1172_s24, %s1519_s24   ;;  %s1100_s23 = sphi %s1170_s23, %s1518_s23   ;;  %s1096_s22 = sphi %s1168_s22, %s1517_s22   ;;  %s1092_s21 = sphi %s1166_s21, %s1516_s21  }
  0x10   : > { %p64_p0 = scmp.ne.s32.totalorder %s1096_s22, %s1092_s21  ;;  %p1491_p1 = scmp.eq.s32.totalorder %s1197_s27, 0 }
  0x11   : > { %p138_p3 = scmp.eq.s32.totalorder %s1494_s28, 1  ;;  %p731_p5 = scmp.ge.s32.totalorder %s1112_s26, 1 }
  0x12   : > { %p1208_p4 = por %p1491_p1, %p64_p0  ;;  %p229_p7 = scmp.lt.s32.totalorder %s1112_s26, 3 }
  0x13   : > { %p1213_p6 = por %p138_p3, %p64_p0  ;;  %s1114_s8 = smov [#allocation5]  }
  0x14   : > { %s1498_s29 = scalar_select %p1208_p4, 1, 0 }
  0x15   : > { %s1499_s30 = scalar_select %p1213_p6, 1, 0 }
  0x16   : > { %p1218_p8 = pnand %p731_p5, %p229_p7  ;;  %s241_s9 = sshll.u32 %s1114_s8, 4  ;;  %s242_s9 = int_to_ptr.vmem [resolvable:$true] %s241_s9 }
  0x17   : > { %s42_s11 = sadd.s32 1, %s1108_s25  ;;  %s1502_s1 = sld [smem:[#allocation19_spill]] }
  0x18   : > { %s1500_s7 = scalar_select %p1218_p8, 1, 0 }
  0x19   : > { %p789_p9 = pneg %p1218_p8 }
  0x1b   : > { %p1227_p11 = pnand %p789_p9, %p1491_p1 }
  0x1d   : > { %s876_s14 = scalar_lea.hbm %s1502_s1, 256  ;;  %p878_p13 = pneg %p1227_p11 }
  0x1e   : > { %p877_p12 = scmp.ne.s32.totalorder %s1502_s1, %s876_s14  ;;  %p883_p5 = scmp.lt.u32.totalorder %s876_s14, %s1502_s1 }
  0x20   : > { %p879_p0 = pnand %p878_p13, %p877_p12 }
  0x22   : > { %p880_p3 = pneg %p879_p0 }
  0x24   : > { %p885_p7 = pnand %p883_p5, %p880_p3 }
  0x26   : > { %888 = shalt.err (!%p885_p7)
}
  0x27   : > { %s889_s19 = scalar_lea.vmem %s242_s9, 256  ;;  %p897_p2 = scmp.lt.s32.totalorder %s242_s9, %s242_s9 }
  0x28   : > { %p890_p9 = scmp.ne.s32.totalorder %s242_s9, %s889_s19  ;;  %p898_p6 = scmp.lt.s32.totalorder %s889_s19, %s889_s19 }
  0x2a   : > { %p892_p10 = pnand %p890_p9, %p878_p13  ;;  %p899_p4 = por %p898_p6, %p897_p2 }
  0x2c   : > { %p893_p1 = pneg %p892_p10 }
  0x2e   : > { %p900_p8 = pnand %p899_p4, %p893_p1 }
  0x30   : > { %903 = shalt.err (!%p900_p8)
}
  0x31   : > { %s1115_s20 = smov 64   ;;  %s1116_s8 = smov 4  }
  0x32   : > { %792 = dma.hbm_to_vmem [thread:$0]  (!%p1227_p11), %s1502_s1, 256, %s242_s9, [#allocation6], %s1115_s20, %s1115_s20, %s1116_s8  }
  0x33   : > { %p44_p1 = scmp.ge.s32.totalorder %s42_s11, 2  ;;  %s51_s14 = sadd.s32 1, %s1100_s23 }
  0x34   : > { %p58_p2 = scmp.ne.s32.totalorder %s1100_s23, %s1096_s22  ;;  %p59_p4 = scmp.eq.s32.totalorder %s1112_s26, 0 }
  0x35   : > { %s1522_s11 = smov (%p44_p1, %s42_s11), 0  ;;  %p1504_p8 = scmp.eq.s32.totalorder %s1197_s27, 1 }
  0x36   : > { %p1254_p6 = por %p59_p4, %p58_p2  ;;  %s46_s10 = ssub.s32 %s1108_s25, %s1522_s11 }
  0x37   : > { %p1260_p10 = por %p1504_p8, %p58_p2  ;;  %p811_p12 = scmp.lt.s32.totalorder %s1112_s26, 2 }
  0x38   : > { %p49_p11 = scmp.eq.s32.totalorder %s46_s10, 0  ;;  %s258_s9 = sand.u32 1, %s1100_s23  }
  0x39   : > { %s734_s17 = sshll.u32 %s258_s9, 2  ;;  %s735_s19 = sshll.u32 %s1108_s25, 6 }
  0x3a   : > { %s1269_s18 = scalar_select %p49_p11, %s1100_s23, %s51_s14  }
  0x3b   : > { %s1506_s0 = sld [smem:[#allocation18_spill]]  ;;  %s262_s13 = scalar_lea.vmem [#allocation2], %s734_s17 }
  0x3c   : > { %s270_s28 = sshll.u32 %s262_s13, 4  ;;  %p1281_p13 = pnand %p811_p12, %p1254_p6  ;;  %s1277_s28 = int_to_ptr.vmem [resolvable:$true] %s270_s28 }
  0x3d   : > { %s259_s14 = scalar_lea.sflag [#allocation3], %s258_s9 }
  0x3e   : > { %p906_p3 = pneg %p1281_p13 }
  0x41   : > { %s1275_s12 = scalar_lea.hbm %s1506_s0, %s735_s19  ;;  %s909_s20 = scalar_lea.hbm %s1506_s0, 128 }
  0x42   : > { %s904_s1 = scalar_lea.hbm %s1275_s12, 64  ;;  %p910_p9 = scmp.lt.u32.totalorder %s1275_s12, %s1506_s0 }
  0x43   : > { %p905_p0 = scmp.ne.s32.totalorder %s1275_s12, %s904_s1  ;;  %p911_p1 = scmp.lt.u32.totalorder %s909_s20, %s904_s1 }
  0x44   : > { %p913_p4 = scmp.lt.u32.totalorder %s904_s1, %s1275_s12 }
  0x45   : > { %p907_p5 = pnand %p906_p3, %p905_p0  ;;  %p912_p2 = por %p911_p1, %p910_p9 }
  0x47   : > { %p908_p7 = pneg %p907_p5  ;;  %p914_p6 = por %p913_p4, %p912_p2 }
  0x49   : > { %p915_p8 = pnand %p914_p6, %p908_p7 }
  0x4b   : > { %918 = shalt.err (!%p915_p8)
}
  0x4c   : > { %s919_s9 = scalar_lea.vmem %s1277_s28, 64  ;;  %s1117_s13 = smov [#allocation2]  }
  0x4d   : > { %p920_p12 = scmp.ne.s32.totalorder %s1277_s28, %s919_s9  ;;  %s924_s17 = sshll.u32 %s1117_s13, 4  ;;  %s925_s17 = int_to_ptr.vmem [resolvable:$false] %s924_s17 }
  0x4e   : > { %s926_s19 = scalar_lea.vmem %s925_s17, 128  ;;  %p927_p5 = scmp.lt.s32.totalorder %s1277_s28, %s925_s17 }
  0x4f   : > { %p922_p11 = pnand %p920_p12, %p906_p3  ;;  %p928_p9 = scmp.lt.s32.totalorder %s926_s19, %s919_s9 }
  0x51   : > { %p923_p0 = pneg %p922_p11  ;;  %p929_p1 = por %p928_p9, %p927_p5 }
  0x53   : > { %p930_p2 = pnand %p929_p1, %p923_p0 }
  0x55   : > { %933 = shalt.err (!%p930_p2)
}
  0x56   : > { %796 = dma.hbm_to_vmem [thread:$0]  (!%p1281_p13), %s1275_s12, 64, %s1277_s28, %s259_s14  }
  0x57   : > { %p1508_p7 = scmp.ne.s32.totalorder %s1500_s7, 0 }
  0x58   : > { %s1313_s1 = sand.u32 (!%p1508_p7), 1, %s1096_s22   ;;  %p1509_p3 = scmp.ne.s32.totalorder (!%p1508_p7), %s1498_s29, 0 }
  0x59   : > { %279 = sbr.rel (%p1508_p7) target bundleno = 583 (0x247), region = 32  ;;  %s1316_s20 = sshll.u32 (!%p1508_p7), %s1313_s1, 2 }
  0x5a   : > { %s282_s15 = scalar_lea.sflag (!%p1508_p7), [#allocation3], %s1313_s1  ;;  %s285_s8 = scalar_lea.vmem (!%p1508_p7), [#allocation2], %s1316_s20 }
  0x60   : > { %1071 = dma.done.wait (%p1509_p3), %s282_s15, 64  }
  0x61   : > { %1073 = vsyncadd (%p1509_p3), %s282_s15, 4294967232  ;;  %p1510_p13 = scmp.eq.s32.totalorder %s1197_s27, 0 }
  0x63   : > { %1075 = dma.done.wait (%p1510_p13), [#allocation6], 256   ;;  %p1511_p4 = pmov %p1510_p13 }
  0x64   : > { %v1118_v0 = vmov 0.0   ;;  %vm1119_vm0 = vmmov 0   ;;  %v874_v1 = vld [vmem:[#allocation5] sm:$0xff]   ;;  %v875_v2 = vld [vmem:[#allocation5 + $0x8] sm:$0xff]   ;;  %v334_v3 = vld [vmem:[%s285_s8] sm:$0xf] }
  0x65   : > { %1077 = vsyncadd (%p1511_p4), [#allocation6], 4294967040  ;;  %767 = vmatprep.subr.bf16.mxu0 %v1118_v0  ;;  %771 = vmatprep.mubr.msk.bf16.mxu0 %vm1119_vm0, %v1118_v0  ;;  %vm358_vm1 = vcmask 261120   ;;  %s1512_s2 = sld [smem:[#allocation20_spill]]  ;;  %s740_s7 = sshll.u32 %s1313_s1, 4  ;;  %vm441_vm2 = vcmask 60416  }
  0x66   : > { %768 = vmatpush3.bf16.msra.mxu0 %v874_v1  ;;  %s1120_s12 = smov 96   ;;  %s1121_s10 = smov 112   ;;  %vm406_vm3 = vcmask 130048  }
  0x67   : > { %769 = vmatprep.subr.bf16.mxu0 %v1118_v0  ;;  %s318_s14 = scalar_lea.vmem [#allocation8], %s740_s7  ;;  %s1122_s9 = smov 120  }
  0x68   : > { %s1123_s13 = smov 104   ;;  %s1124_s17 = smov 88  }
  0x69   : > { %s739_s19 = sshll.u32 %s1313_s1, 3  ;;  %s511_s15 = sshll.u32 %s318_s14, 4  ;;  %s1334_s15 = int_to_ptr.vmem [resolvable:$true] %s511_s15 }
  0x6a   : > { %770 = vmatpush3.bf16.msra.mxu0 %v875_v2  ;;  %s311_s8 = scalar_lea.vmem [#allocation7], %s739_s19  ;;  %s472_s28 = sand.u32 1, %s1197_s27  }
  0x6b   : > { %v743_v4 = vld [vmem:[%s1512_s2] ss:$0 sm:$0xff]  ;;  %s763_s29 = sshll.u32 %s1104_s24, 8  ;;  %s497_s19 = sshll.u32 %s311_s8, 4  ;;  %s1352_s19 = int_to_ptr.vmem [resolvable:$true] %s497_s19 }
  0x6c   : > { %s758_s0 = sshll.u32 %s1104_s24, 6  ;;  %s934_s7 = scalar_lea.vmem %s1334_s15, 256 }
  0x6d   : > { %772 = vmatmul.mubr.msk.bf16.vlgmr.msra.gmra.mrb[0].mxu0 %vm358_vm1, %v334_v3  ;;  %p935_p6 = scmp.ne.s32.totalorder %s1334_s15, %s934_s7 }
  0x6f   : > { %p936_p8 = pnand %p935_p6, %p1260_p10 }
  0x71   : > { %p937_p12 = pneg %p936_p8 }
 0x140   : > { %v396_v5 = vpop.f32.mrb[0].mxu0 }
 0x141   : > { %v397_v6 = vadd.f32 %v743_v4, %v396_v5  ;;  %v773_v7 = vpop.f32.mrb[1].mxu0 }
 0x142   : > { %v399_v8 = vpop.f32.mrb[2].mxu0 }
 0x143   : > { %v443_v9 = vpack.c.bf16 %v397_v6, %v397_v6  ;;  %403 = vrot.lane.b32.xlu0 %v397_v6, %s1120_s12  ;;  %v774_v10 = vpop.f32.mrb[3].mxu0  ;;  %s1125_s12 = smov [#allocation8]  }
 0x144   : > { %s938_s2 = sshll.u32 %s1125_s12, 4  ;;  %s939_s2 = int_to_ptr.vmem [resolvable:$false] %s938_s2 }
 0x145   : > { %457 = vrot.lane.b32.xlu1 %v443_v9, %s1121_s10  ;;  %451 = vst.msk [vmem:[%s318_s14] sm:$0xf] %vm441_vm2, %v443_v9  ;;  %s1342_s10 = scalar_lea.hbm %s1488_s4, %s763_s29  ;;  %s1355_s29 = scalar_lea.sflag [#allocation9], %s472_s28 }
 0x146   : > { %p941_p11 = scmp.lt.s32.totalorder %s1334_s15, %s939_s2 }
 0x147   : > { %452 = vrot.lane.b32.xlu0 %v443_v9, %s1122_s9  ;;  %s755_s9 = sshll.u32 %s1104_s24, 7 }
 0x148   : > { %s1349_s27 = scalar_lea.hbm %s1487_s3, %s755_s9 }
 0x149   : > { %462 = vrot.lane.b32.xlu1 %v443_v9, %s1123_s13  ;;  %s940_s13 = scalar_lea.vmem %s939_s2, 512 }
 0x14a   : > { %p942_p0 = scmp.lt.s32.totalorder %s940_s13, %s934_s7 }
 0x14b   : > { %447 = vrot.lane.b32.xlu0 %v443_v9, %s1124_s17 }
 0x14c   : > { %p943_p5 = por %p942_p0, %p941_p11 }
 0x14e   : > { %p944_p9 = pnand %p943_p5, %p937_p12 }
 0x1b5   : > { %v404_v11 = vpop.permute.xlu0 %403 }
 0x1b6   : > { %407 = vst.msk [vmem:[%s311_s8] sm:$0xff] %vm406_vm3, %v404_v11  ;;  %408 = vxpose.xlu1.b32.start.end [1/1] (short) (narrow) %v404_v11, 8 }
 0x1b7   : > { %v458_v12 = vpop.permute.xlu1 %457 }
 0x1b8   : > { %749 = vst.msk [vmem:[%s318_s14 + $0x8] sm:$0xf] %vm441_vm2, %v458_v12 }
 0x1b9   : > { %v453_v13 = vpop.permute.xlu0 %452 }
 0x1ba   : > { %748 = vst.msk [vmem:[%s318_s14 + $0x4] sm:$0xf] %vm441_vm2, %v453_v13 }
 0x1bb   : > { %v463_v14 = vpop.permute.xlu1 %462 }
 0x1bc   : > { %750 = vst.msk [vmem:[%s318_s14 + $0xc] sm:$0xf] %vm441_vm2, %v463_v14 }
 0x1bd   : > { %v448_v15 = vpop.permute.xlu0 %447 }
 0x1be   : > { %947 = shalt.err (!%p944_p9)
}
 0x1bf   : > { %s948_s14 = scalar_lea.hbm %s1342_s10, 256  ;;  %s952_s9 = scalar_lea.hbm %s1488_s4, 512 }
 0x1c0   : > { %p949_p1 = scmp.ne.s32.totalorder %s1342_s10, %s948_s14  ;;  %p953_p3 = scmp.lt.u32.totalorder %s1342_s10, %s1488_s4 }
 0x1c1   : > { %p954_p13 = scmp.lt.u32.totalorder %s952_s9, %s948_s14  ;;  %p956_p6 = scmp.lt.u32.totalorder %s948_s14, %s1342_s10 }
 0x1c2   : > { %p950_p2 = pnand %p949_p1, %p1260_p10 }
 0x1c3   : > { %p955_p4 = por %p954_p13, %p953_p3 }
 0x1c4   : > { %p951_p7 = pneg %p950_p2 }
 0x1c5   : > { %p957_p8 = por %p956_p6, %p955_p4 }
 0x1c7   : > { %p958_p12 = pnand %p957_p8, %p951_p7 }
 0x1c9   : > { %961 = shalt.err (!%p958_p12)
}
 0x1ca   : > { %s1126_s7 = smov 64   ;;  %s1127_s12 = smov 4  }
 0x1cb   : > { %782 = dma.vmem_to_hbm [thread:$0]  (%p1260_p10), %s1334_s15, 256, %s1342_s10, %s1355_s29, %s1126_s7, %s1126_s7, %s1127_s12  }
 0x1cc   : > { %s332_s13 = scalar_lea.vmem [#allocation11], %s1316_s20  ;;  %s468_s14 = scalar_lea.sflag [#allocation4], %s1313_s1 }
 0x1cd   : > { %450 = vst.msk [vmem:[%s332_s13] sm:$0xf] %vm441_vm2, %v448_v15  ;;  %s962_s8 = scalar_lea.vmem %s1352_s19, 128  ;;  %s1128_s28 = smov [#allocation7]  }
 0x1ce   : > { %p963_p11 = scmp.ne.s32.totalorder %s1352_s19, %s962_s8  ;;  %s966_s9 = sshll.u32 %s1128_s28, 4  ;;  %s967_s9 = int_to_ptr.vmem [resolvable:$false] %s966_s9 }
 0x1cf   : > { %s968_s17 = scalar_lea.vmem %s967_s9, 256  ;;  %p969_p9 = scmp.lt.s32.totalorder %s1352_s19, %s967_s9 }
 0x1d0   : > { %p964_p0 = pnand %p963_p11, %p1260_p10  ;;  %p970_p1 = scmp.lt.s32.totalorder %s968_s17, %s962_s8 }
 0x1d2   : > { %p965_p5 = pneg %p964_p0  ;;  %p971_p2 = por %p970_p1, %p969_p9 }
 0x1d4   : > { %p972_p7 = pnand %p971_p2, %p965_p5 }
 0x1d6   : > { %975 = shalt.err (!%p972_p7)
}
 0x1d7   : > { %s976_s15 = scalar_lea.hbm %s1349_s27, 128  ;;  %s980_s7 = scalar_lea.hbm %s1487_s3, 256 }
 0x1d8   : > { %p977_p3 = scmp.ne.s32.totalorder %s1349_s27, %s976_s15  ;;  %p981_p6 = scmp.lt.u32.totalorder %s1349_s27, %s1487_s3 }
 0x1d9   : > { %p982_p8 = scmp.lt.u32.totalorder %s980_s7, %s976_s15  ;;  %p984_p11 = scmp.lt.u32.totalorder %s976_s15, %s1349_s27 }
 0x1da   : > { %p978_p13 = pnand %p977_p3, %p1260_p10 }
 0x1db   : > { %p983_p12 = por %p982_p8, %p981_p6 }
 0x1dc   : > { %p979_p4 = pneg %p978_p13 }
 0x1dd   : > { %p985_p0 = por %p984_p11, %p983_p12 }
 0x1df   : > { %p986_p5 = pnand %p985_p0, %p979_p4 }
 0x1e1   : > { %989 = shalt.err (!%p986_p5)
}
 0x1e2   : > { %781 = dma.vmem_to_hbm [thread:$0]  (%p1260_p10), %s1352_s19, 128, %s1349_s27, %s468_s14  }
 0x1e3   : > { %s1410_s17 = scalar_lea.hbm %s1490_s6, %s758_s0  ;;  %s542_s15 = sshll.u32 %s332_s13, 4  ;;  %s543_s15 = int_to_ptr.vmem [resolvable:$true] %s542_s15 }
 0x1e4   : > { %s483_s10 = scalar_lea.sflag [#allocation12], %s1313_s1  ;;  %s990_s2 = scalar_lea.vmem %s543_s15, 64 }
 0x1e5   : > { %p991_p9 = scmp.ne.s32.totalorder %s543_s15, %s990_s2  ;;  %s1129_s7 = smov [#allocation11]  }
 0x1e6   : > { %s994_s12 = sshll.u32 %s1129_s7, 4  ;;  %s995_s12 = int_to_ptr.vmem [resolvable:$false] %s994_s12 }
 0x1e7   : > { %p992_p1 = pnand %p991_p9, %p1260_p10  ;;  %s996_s28 = scalar_lea.vmem %s995_s12, 128 }
 0x1e8   : > { %p997_p7 = scmp.lt.s32.totalorder %s543_s15, %s995_s12  ;;  %p998_p3 = scmp.lt.s32.totalorder %s996_s28, %s990_s2 }
 0x1e9   : > { %p993_p2 = pneg %p992_p1 }
 0x1ea   : > { %p999_p13 = por %p998_p3, %p997_p7 }
 0x1ec   : > { %p1000_p4 = pnand %p999_p13, %p993_p2 }
 0x1ee   : > { %1003 = shalt.err (!%p1000_p4)
}
 0x1ef   : > { %s1004_s1 = scalar_lea.hbm %s1410_s17, 64  ;;  %s1008_s13 = scalar_lea.hbm %s1490_s6, 128 }
 0x1f0   : > { %p1005_p6 = scmp.ne.s32.totalorder %s1410_s17, %s1004_s1  ;;  %p1009_p11 = scmp.lt.u32.totalorder %s1410_s17, %s1490_s6 }
 0x1f1   : > { %p1010_p0 = scmp.lt.u32.totalorder %s1008_s13, %s1004_s1  ;;  %p1012_p9 = scmp.lt.u32.totalorder %s1004_s1, %s1410_s17 }
 0x1f2   : > { %p1006_p8 = pnand %p1005_p6, %p1260_p10 }
 0x1f3   : > { %p1011_p5 = por %p1010_p0, %p1009_p11 }
 0x1f4   : > { %p1007_p12 = pneg %p1006_p8 }
 0x1f5   : > { %p1013_p1 = por %p1012_p9, %p1011_p5 }
 0x1f7   : > { %p1014_p2 = pnand %p1013_p1, %p1007_p12 }
 0x1f9   : > { %1017 = shalt.err (!%p1014_p2)
}
 0x1fa   : > { %784 = dma.vmem_to_hbm [thread:$0]  (%p1260_p10), %s543_s15, 64, %s1410_s17, %s483_s10  }
 0x1fb   : > { %s325_s9 = scalar_lea.vmem [#allocation10], %s1316_s20  ;;  %s1438_s28 = scalar_lea.hbm %s1489_s5, %s758_s0 }
 0x1fc   : > { %s528_s2 = sshll.u32 %s325_s9, 4  ;;  %s1130_s27 = smov [#allocation10]   ;;  %s529_s2 = int_to_ptr.vmem [resolvable:$true] %s528_s2 }
 0x1fd   : > { %s1018_s1 = scalar_lea.vmem %s529_s2, 64  ;;  %s1022_s17 = sshll.u32 %s1130_s27, 4  ;;  %s1023_s17 = int_to_ptr.vmem [resolvable:$false] %s1022_s17 }
 0x1fe   : > { %p1019_p7 = scmp.ne.s32.totalorder %s529_s2, %s1018_s1  ;;  %s1024_s20 = scalar_lea.vmem %s1023_s17, 128 }
 0x1ff   : > { %p1025_p4 = scmp.lt.s32.totalorder %s529_s2, %s1023_s17  ;;  %p1026_p6 = scmp.lt.s32.totalorder %s1024_s20, %s1018_s1 }
 0x200   : > { %p1020_p3 = pnand %p1019_p7, %p1260_p10 }
 0x201   : > { %p1027_p8 = por %p1026_p6, %p1025_p4 }
 0x202   : > { %p1021_p13 = pneg %p1020_p3 }
 0x204   : > { %p1028_p12 = pnand %p1027_p8, %p1021_p13 }
 0x236   : > { %v424_v16 = vpop.trf.xlu1 }
 0x237   : > { %v440_v17 = vpack.c.bf16 %v424_v16, %v424_v16 }
 0x239   : > { %442 = vst.msk [vmem:[%s325_s9] sm:$0xf] %vm441_vm2, %v440_v17 }
 0x23a   : > { %1031 = shalt.err (!%p1028_p12)
}
 0x23b   : > { %s1032_s0 = scalar_lea.hbm %s1438_s28, 64  ;;  %s1036_s10 = scalar_lea.hbm %s1489_s5, 128 }
 0x23c   : > { %p1033_p11 = scmp.ne.s32.totalorder %s1438_s28, %s1032_s0  ;;  %p1037_p9 = scmp.lt.u32.totalorder %s1438_s28, %s1489_s5 }
 0x23d   : > { %p1038_p1 = scmp.lt.u32.totalorder %s1036_s10, %s1032_s0  ;;  %p1040_p7 = scmp.lt.u32.totalorder %s1032_s0, %s1438_s28 }
 0x23e   : > { %p1034_p0 = pnand %p1033_p11, %p1260_p10 }
 0x23f   : > { %p1039_p2 = por %p1038_p1, %p1037_p9 }
 0x240   : > { %p1035_p5 = pneg %p1034_p0 }
 0x241   : > { %p1041_p3 = por %p1040_p7, %p1039_p2 }
 0x243   : > { %p1042_p13 = pnand %p1041_p3, %p1035_p5 }
 0x245   : > { %1045 = shalt.err (!%p1042_p13)
}
 0x246   : > { %783 = dma.vmem_to_hbm [thread:$0]  (%p1260_p10), %s529_s2, 64, %s1438_s28, %s1355_s29  }
 0x247 PF: > { %s554_s14 = sand.u32 1, %s1092_s21   ;;  %p1513_p4 = scmp.ne.s32.totalorder %s1499_s30, 0 }
 0x248   : > { %p1514_p6 = scmp.ge.s32.totalorder %s1112_s26, 2  ;;  %s555_s8 = scalar_lea.sflag [#allocation4], %s554_s14 }
 0x24a   : > { %p798_p8 = pnand %p1514_p6, %p1513_p4 }
 0x24c   : > { %1079 = dma.done.wait (!%p798_p8), %s555_s8, 128  }
 0x24d   : > { %1081 = vsyncadd (!%p798_p8), %s555_s8, 4294967168  ;;  %s1515_s9 = sadd.s32 4294967294, %s1112_s26  }
 0x24e   : > { %s563_s7 = sand.u32 1, %s1515_s9  }
 0x24f   : > { %s564_s12 = scalar_lea.sflag [#allocation9], %s563_s7 }
 0x250   : > { %1083 = dma.done.wait (!%p798_p8), %s564_s12, 320  }
 0x251   : > { %1085 = vsyncadd (!%p798_p8), %s564_s12, 4294966976  ;;  %s582_s16 = scalar_lea.sflag [#allocation12], %s554_s14 }
 0x252   : > { %1087 = dma.done.wait (!%p798_p8), %s582_s16, 64  }
 0x253   : > { %1089 = vsyncadd (!%p798_p8), %s582_s16, 4294967232  ;;  %s30_s26 = sadd.s32 1, %s1112_s26   ;;  %s1516_s21 = smov %s1096_s22 }
 0x254   : > { %p27_p10 = scmp.ge.s32.totalorder %s30_s26, 4   ;;  %s1517_s22 = smov %s1100_s23 }
 0x255   : > { %s1518_s23 = smov %s1269_s18  ;;  %s1519_s24 = smov %s1108_s25 }
 0x256   : > { %s1520_s25 = smov %s1522_s11  ;;  %29 = sbr.rel (!%p27_p10) target bundleno = 15 (0xf), region = 133 }
 0x25d   :  { %587 = vsyncpa [#allocation3], 1 }
 0x25e   :  { %589 = vsyncpa [#allocation3 + $0x1], 1 }
 0x25f   :  { %590 = vsyncpa [#allocation6], 1 }
 0x260   :  { %591 = vsyncpa [#allocation4], 1 }
 0x261   :  { %593 = vsyncpa [#allocation4 + $0x1], 1 }
 0x262   :  { %594 = vsyncpa [#allocation9], 1 }
 0x263   :  { %596 = vsyncpa [#allocation9 + $0x1], 1 }
 0x264   :  { %597 = vsyncpa [#allocation12], 1 }
 0x265   :  { %599 = vsyncpa [#allocation12 + $0x1], 1 }

</bundles_post_ra>
